<compile_context>
chip_gen: v7x
topology: tpu7x:2x2x1
jax: 0.10.0
libtpu: 0.0.40
codegen_flags: <defaults>
</compile_context>

<pallas_src>
import jax
import jax.numpy as jnp
from jax import lax
from jax.experimental import pallas as pl
from jax.experimental.pallas import tpu as pltpu


def _round_up(a, m):
    return (a + m - 1) // m * m


def _cdiv(a, b):
    return (a + b - 1) // b


def _vmem_budget_bytes():
    """Per-generation VMEM budget (leave headroom for internal scratch)."""
    cap = 64 * 1024 * 1024  # conservative default (v7x per-core VMEM)
    try:
        info = pltpu.get_tpu_info()
        cap = int(getattr(info, "vmem_capacity_bytes", cap)) or cap
    except Exception:
        pass
    return int(min(cap - 16 * 1024 * 1024, 112 * 1024 * 1024))


def _select_tiles(cout_p, kd, n_cols, batch, budget, in_bytes, out_bytes):
    """Pick (tk, tn): contraction tile and column tile under the VMEM budget."""
    n128 = max(128, _round_up(n_cols, 128))
    tn_cands = [t for t in (1024, 512, 256, 128) if t <= n128] or [128]
    tk_cands = ([kd] if kd <= 8192 else []) + [t for t in (512, 256, 128) if t < kd]
    if not tk_cands:
        tk_cands = [kd]
    for tn in tn_cands:
        for tk in tk_cands:
            need = (2 * cout_p * tk * in_bytes        # weight blocks (double-buffered)
                    + 2 * tk * tn * in_bytes          # x_col blocks
                    + 2 * cout_p * tn * out_bytes     # output blocks
                    + cout_p * tn * 4                 # f32 accumulator scratch
                    + 4 * cout_p * 4                  # BN scale/shift
                    + (1 << 20))                      # headroom
            if need <= budget:
                # keep >= 2 parallel grid steps so both v7x TensorCores get work
                if batch == 1 and n128 > 128:
                    while tn > 128 and _cdiv(n128, tn) < 2:
                        tn //= 2
                return tk, tn
    return tk_cands[-1], 128


def _aspp_gemm_bn_relu_kernel(w_ref, scale_ref, shift_ref, x_ref, o_ref, acc_ref):
    # w_ref:     (Cout_p, Tk)  bf16   folded conv weight chunk
    # scale_ref: (Cout_p, 1)   f32    BN scale = gamma / sqrt(var + eps)
    # shift_ref: (Cout_p, 1)   f32    BN shift = beta - mean * scale
    # x_ref:     (Tk, Tn)      bf16   im2col columns chunk (one batch element)
    # o_ref:     (Cout_p, Tn)         output chunk
    # acc_ref:   (Cout_p, Tn)  f32    accumulator across the K (contraction) axis
    k = pl.program_id(2)

    @pl.when(k == 0)
    def _init():
        acc_ref[...] = jnp.zeros_like(acc_ref)

    acc_ref[...] += jnp.dot(w_ref[...], x_ref[...],
                            preferred_element_type=jnp.float32)

    @pl.when(k == pl.num_programs(2) - 1)
    def _finalize():
        y = acc_ref[...] * scale_ref[...] + shift_ref[...]   # per-channel BN (f32)
        o_ref[...] = jnp.maximum(y, 0.0).astype(o_ref.dtype)  # ReLU + downcast


def aspp_forward(x, weight, bn_gamma, bn_beta, bn_mean, bn_var,
                 *, padding, dilation, eps=1e-5, compute_dtype=jnp.bfloat16):
    """x: (B, Cin, H, W); weight: (Cout, Cin, K, K) (PyTorch OIHW, bias-free)."""
    B, Cin, H, W = x.shape
    Cout, Cin_w, K, K2 = weight.shape
    assert Cin_w == Cin and K == K2
    d, p = int(dilation), int(padding)
    Hout = H + 2 * p - d * (K - 1)
    Wout = W + 2 * p - d * (K - 1)
    assert Hout > 0 and Wout > 0

    out_dtype = x.dtype
    in_bytes = jnp.dtype(compute_dtype).itemsize
    out_bytes = jnp.dtype(out_dtype).itemsize

    Kd = Cin * K * K
    n_cols = Hout * Wout
    Cout_p = _round_up(Cout, 8)

    budget = _vmem_budget_bytes()
    tk, tn = _select_tiles(Cout_p, Kd, n_cols, B, budget, in_bytes, out_bytes)
    Np = _round_up(n_cols, tn)
    Kd_p = Kd if tk == Kd else _round_up(Kd, tk)

    # ---- layout plumbing in XLA: cast to bf16 first (halves im2col traffic),
    #      zero-pad, extract K*K taps, contiguous cin-outer/tap-inner reshape ----
    xc = x.astype(compute_dtype)
    xp = jnp.pad(xc, ((0, 0), (0, 0), (p, p), (p, p)))
    taps = [lax.slice(xp, (0, 0, kh * d, kw * d),
                      (B, Cin, kh * d + Hout, kw * d + Wout))
            for kh in range(K) for kw in range(K)]
    # (B, Cin, K*K, Ho, Wo) -> (B, Cin*K*K, Ho*Wo): contiguous, no transpose;
    # row order (cin, kh, kw) matches weight.reshape(Cout, Cin*K*K) directly.
    x_col = jnp.stack(taps, axis=2).reshape(B, Kd, n_cols)
    x_col = jnp.pad(x_col, ((0, 0), (0, Kd_p - Kd), (0, Np - n_cols)))

    w2 = weight.reshape(Cout, Kd).astype(compute_dtype)
    w2 = jnp.pad(w2, ((0, Cout_p - Cout), (0, Kd_p - Kd)))

    # Fold eval-mode BatchNorm into a per-channel affine (f32).
    inv_std = 1.0 / jnp.sqrt(bn_var.astype(jnp.float32) + eps)
    scale = bn_gamma.astype(jnp.float32) * inv_std
    shift = bn_beta.astype(jnp.float32) - bn_mean.astype(jnp.float32) * scale
    scale = jnp.pad(scale, (0, Cout_p - Cout)).reshape(Cout_p, 1)
    shift = jnp.pad(shift, (0, Cout_p - Cout)).reshape(Cout_p, 1)

    nN = Np // tn
    nK = Kd_p // tk

    cost = pl.CostEstimate(
        flops=2 * Cout_p * Kd_p * B * Np,
        transcendentals=0,
        bytes_accessed=(B * Kd_p * Np * in_bytes            # x_col stream
                        + nN * B * Cout_p * Kd_p * in_bytes  # weight re-reads
                        + B * Cout_p * Np * out_bytes        # output write
                        + 2 * Cout_p * 4),
    )

    out_col = pl.pallas_call(
        _aspp_gemm_bn_relu_kernel,
        out_shape=jax.ShapeDtypeStruct((B, Cout_p, Np), out_dtype),
        grid=(B, nN, nK),
        in_specs=[
            pl.BlockSpec((Cout_p, tk), lambda b, n, k: (0, k)),      # weight chunk
            pl.BlockSpec((Cout_p, 1), lambda b, n, k: (0, 0)),       # BN scale
            pl.BlockSpec((Cout_p, 1), lambda b, n, k: (0, 0)),       # BN shift
            pl.BlockSpec((None, tk, tn), lambda b, n, k: (b, k, n)), # im2col chunk
        ],
        out_specs=pl.BlockSpec((None, Cout_p, tn), lambda b, n, k: (b, 0, n)),
        scratch_shapes=[pltpu.VMEM((Cout_p, tn), jnp.float32)],
        compiler_params=pltpu.CompilerParams(
            dimension_semantics=("parallel", "parallel", "arbitrary"),
            vmem_limit_bytes=int(budget)),
        cost_estimate=cost,
    )(w2, scale, shift, x_col)

    # (B, Cout_p, Np) -> strip padding -> (B, Cout, Ho, Wo); no transpose needed.
    return out_col[:, :Cout, :n_cols].reshape(B, Cout, Hout, Wout)


def aspp_reference(x, weight, bn_gamma, bn_beta, bn_mean, bn_var,
                   *, padding, dilation, eps=1e-5, compute_dtype=jnp.bfloat16):
    """Reference with the same bf16 operand rounding, f32 accumulation."""
    xr = x.astype(compute_dtype).astype(jnp.float32)
    wr = weight.astype(compute_dtype).astype(jnp.float32)
    conv = lax.conv_general_dilated(
        xr, wr, window_strides=(1, 1),
        padding=((padding, padding), (padding, padding)),
        rhs_dilation=(dilation, dilation),
        dimension_numbers=("NCHW", "OIHW", "NCHW"))
    inv_std = 1.0 / jnp.sqrt(bn_var.astype(jnp.float32) + eps)
    s = (bn_gamma * inv_std)[None, :, None, None]
    b = (bn_beta - bn_mean * bn_gamma * inv_std)[None, :, None, None]
    return jnp.maximum(conv * s + b, 0.0).astype(x.dtype)


if __name__ == "__main__":
    key = jax.random.PRNGKey(0)
    B, Cin, H, W = 2, 4, 16, 16
    Cout, K, dilation = 8, 3, 2
    padding = dilation  # standard ASPP 3x3 branch: padding == dilation

    k1, k2, k3, k4 = jax.random.split(key, 4)
    x = jax.random.normal(k1, (B, Cin, H, W), dtype=jnp.float32)
    fan_in = Cin * K * K
    weight = jax.random.normal(k2, (Cout, Cin, K, K), dtype=jnp.float32) * (2.0 / fan_in) ** 0.5
    # Module init sets BN weight=1, bias=0; use non-trivial values so the folded
    # affine path is actually exercised.
    bn_gamma = 1.0 + 0.1 * jnp.arange(Cout, dtype=jnp.float32)
    bn_beta = 0.05 * jnp.arange(Cout, dtype=jnp.float32)
    bn_mean = 0.1 * jax.random.normal(k3, (Cout,), dtype=jnp.float32)
    bn_var = 0.5 + 0.5 * jnp.abs(jax.random.normal(k4, (Cout,), dtype=jnp.float32))

    out = aspp_forward(x, weight, bn_gamma, bn_beta, bn_mean, bn_var,
                       padding=padding, dilation=dilation)
    out = jax.block_until_ready(out)

    ref = aspp_reference(x, weight, bn_gamma, bn_beta, bn_mean, bn_var,
                         padding=padding, dilation=dilation)
    assert out.shape == (B, Cout, H, W)
    err = float(jnp.max(jnp.abs(out.astype(jnp.float32) - ref.astype(jnp.float32))))
    assert err < 1e-3, f"mismatch vs reference, max err {err}"

    print("KERNEL_OK")
</pallas_src>

<mosaic_0001>
module attributes {stable_mosaic.version = 11 : i64} {
  func.func @_aspp_gemm_bn_relu_kernel(%arg0: i32, %arg1: i32, %arg2: i32, %arg3: memref<8x36xbf16, #tpu.memory_space<vmem>>, %arg4: memref<8x1xf32, #tpu.memory_space<vmem>>, %arg5: memref<8x1xf32, #tpu.memory_space<vmem>>, %arg6: memref<1x36x256xbf16, #tpu.memory_space<vmem>>, %arg7: memref<1x8x256xf32, #tpu.memory_space<vmem>>, %arg8: memref<8x256xf32, #tpu.memory_space<vmem>>) attributes {dimension_semantics = [#tpu.dimension_semantics<parallel>, #tpu.dimension_semantics<parallel>, #tpu.dimension_semantics<arbitrary>], iteration_bounds = array<i64: 2, 1, 1>, scalar_prefetch = 0 : i64, scratch_operands = 1 : i64, tpu.core_type = #tpu.core_type<tc>, window_params = [{transform_indices = @transform_0, window_bounds = array<i64: 8, 36>}, {pipeline_mode = #tpu.pipeline_mode<synchronous>, transform_indices = @transform_1, window_bounds = array<i64: 8, 1>}, {pipeline_mode = #tpu.pipeline_mode<synchronous>, transform_indices = @transform_2, window_bounds = array<i64: 8, 1>}, {transform_indices = @transform_3, window_bounds = array<i64: 1, 36, 256>}, {transform_indices = @transform_4, window_bounds = array<i64: 1, 8, 256>}]} {
    %c0_i32 = arith.constant 0 : i32
    %0 = arith.cmpi eq, %arg2, %c0_i32 : i32
    %1 = arith.extui %0 : i1 to i32
    %c0_i32_0 = arith.constant 0 : i32
    %2 = arith.cmpi ne, %1, %c0_i32_0 : i32
    scf.if %2 {
      %cst_11 = arith.constant 0.000000e+00 : f32
      %13 = vector.broadcast %cst_11 : f32 to vector<8x256xf32>
      %c0_12 = arith.constant 0 : index
      %c0_13 = arith.constant 0 : index
      %14 = vector.load %arg8[%c0_12, %c0_13] : memref<8x256xf32, #tpu.memory_space<vmem>>, vector<8x256xf32>
      tpu.vector_store %arg8[%c0_12, %c0_13], %13 {strides = array<i32>} : memref<8x256xf32, #tpu.memory_space<vmem>>, vector<8x256xf32>,
    } else {
    }
    %c0 = arith.constant 0 : index
    %c0_1 = arith.constant 0 : index
    %3 = vector.load %arg8[%c0, %c0_1] : memref<8x256xf32, #tpu.memory_space<vmem>>, vector<8x256xf32>
    %c0_2 = arith.constant 0 : index
    %c0_3 = arith.constant 0 : index
    %4 = vector.load %arg3[%c0_2, %c0_3] : memref<8x36xbf16, #tpu.memory_space<vmem>>, vector<8x36xbf16>
    %c0_4 = arith.constant 0 : index
    %c0_5 = arith.constant 0 : index
    %c0_6 = arith.constant 0 : index
    %5 = vector.load %arg6[%c0_4, %c0_5, %c0_6] : memref<1x36x256xbf16, #tpu.memory_space<vmem>>, vector<1x36x256xbf16>
    %6 = vector.shape_cast %5 : vector<1x36x256xbf16> to vector<36x256xbf16>
    %cst = arith.constant dense<0.000000e+00> : vector<8x256xf32>
    %7 = tpu.matmul %4, %6, %cst {dimension_numbers = #tpu.dot_dimension_numbers<[1], [0], [0], [1], [0, 0, 1, 1], [], []>} : vector<8x36xbf16>, vector<36x256xbf16>, vector<8x256xf32> -> vector<8x256xf32>
    %8 = arith.addf %3, %7 : vector<8x256xf32>
    %c0_7 = arith.constant 0 : index
    %c0_8 = arith.constant 0 : index
    %9 = vector.load %arg8[%c0_7, %c0_8] : memref<8x256xf32, #tpu.memory_space<vmem>>, vector<8x256xf32>
    tpu.vector_store %arg8[%c0_7, %c0_8], %8 {strides = array<i32>} : memref<8x256xf32, #tpu.memory_space<vmem>>, vector<8x256xf32>,
    %c0_i32_9 = arith.constant 0 : i32
    %10 = arith.cmpi eq, %arg2, %c0_i32_9 : i32
    %11 = arith.extui %10 : i1 to i32
    %c0_i32_10 = arith.constant 0 : i32
    %12 = arith.cmpi ne, %11, %c0_i32_10 : i32
    scf.if %12 {
      %c0_11 = arith.constant 0 : index
      %c0_12 = arith.constant 0 : index
      %13 = vector.load %arg8[%c0_11, %c0_12] : memref<8x256xf32, #tpu.memory_space<vmem>>, vector<8x256xf32>
      %c0_13 = arith.constant 0 : index
      %c0_14 = arith.constant 0 : index
      %14 = vector.load %arg4[%c0_13, %c0_14] : memref<8x1xf32, #tpu.memory_space<vmem>>, vector<8x1xf32>
      %15 = vector.broadcast %14 : vector<8x1xf32> to vector<8x256xf32>
      %16 = arith.mulf %13, %15 : vector<8x256xf32>
      %c0_15 = arith.constant 0 : index
      %c0_16 = arith.constant 0 : index
      %17 = vector.load %arg5[%c0_15, %c0_16] : memref<8x1xf32, #tpu.memory_space<vmem>>, vector<8x1xf32>
      %18 = vector.broadcast %17 : vector<8x1xf32> to vector<8x256xf32>
      %19 = arith.addf %16, %18 : vector<8x256xf32>
      %cst_17 = arith.constant 0.000000e+00 : f32
      %20 = vector.broadcast %cst_17 : f32 to vector<8x256xf32>
      %21 = arith.maximumf %19, %20 : vector<8x256xf32>
      %c0_18 = arith.constant 0 : index
      %c0_19 = arith.constant 0 : index
      %c0_20 = arith.constant 0 : index
      %22 = vector.load %arg7[%c0_18, %c0_19, %c0_20] : memref<1x8x256xf32, #tpu.memory_space<vmem>>, vector<1x8x256xf32>
      %23 = vector.shape_cast %22 : vector<1x8x256xf32> to vector<8x256xf32>
      %24 = vector.shape_cast %21 : vector<8x256xf32> to vector<1x8x256xf32>
      tpu.vector_store %arg7[%c0_18, %c0_19, %c0_20], %24 {strides = array<i32>} : memref<1x8x256xf32, #tpu.memory_space<vmem>>, vector<1x8x256xf32>,
    } else {
    }
    return
  }
  func.func @transform_0(%arg0: i32, %arg1: i32, %arg2: i32) -> (i32, i32) {
    %c0_i32 = arith.constant 0 : i32
    %c0_i32_0 = arith.constant 0 : i32
    return %c0_i32, %arg2 : i32, i32
  }
  func.func @transform_1(%arg0: i32, %arg1: i32, %arg2: i32) -> (i32, i32) {
    %c0_i32 = arith.constant 0 : i32
    %c0_i32_0 = arith.constant 0 : i32
    %c0_i32_1 = arith.constant 0 : i32
    return %c0_i32, %c0_i32_0 : i32, i32
  }
  func.func @transform_2(%arg0: i32, %arg1: i32, %arg2: i32) -> (i32, i32) {
    %c0_i32 = arith.constant 0 : i32
    %c0_i32_0 = arith.constant 0 : i32
    %c0_i32_1 = arith.constant 0 : i32
    return %c0_i32, %c0_i32_0 : i32, i32
  }
  func.func @transform_3(%arg0: i32, %arg1: i32, %arg2: i32) -> (i32, i32, i32) {
    %c0_i32 = arith.constant 0 : i32
    return %arg0, %arg2, %arg1 : i32, i32, i32
  }
  func.func @transform_4(%arg0: i32, %arg1: i32, %arg2: i32) -> (i32, i32, i32) {
    %c0_i32 = arith.constant 0 : i32
    %c0_i32_0 = arith.constant 0 : i32
    return %arg0, %c0_i32, %arg1 : i32, i32, i32
  }
}

</mosaic_0001>

<bundles_post_ra>
// kernel: tpu_custom_call.1
= control target key start
LH: loop header
LB: loop body
LE: loop exit
PB: predicated region body
PF: predicated region fallthrough
CT: control target
= control target key end

     0   :  { %9 = vsyncpa [#allocation4], 0  ;;  %s824_s0 = inlined_call_operand.vmem [shape: bf16[8,36], index: 0, kind: input, shape index: {}]   ;;  %s825_s1 = inlined_call_operand.vmem [shape: f32[8,1], index: 1, kind: input, shape index: {}]   ;;  %s826_s2 = inlined_call_operand.vmem [shape: f32[8,1], index: 2, kind: input, shape index: {}]   ;;  %s827_s3 = inlined_call_operand.vmem [shape: bf16[2,36,256], index: 3, kind: input, shape index: {}]   ;;  %s828_s4 = inlined_call_operand.hbm [shape: f32[2,8,256], index: 4, kind: output, shape index: {}]  }
   0x1   :  { %11 = vsyncpa [#allocation4 + $0x1], 0  ;;  %s703_s15 = smov 0   ;;  %s705_s16 = smov 0  }
   0x2   :  { %s707_s17 = smov 0   ;;  %s709_s18 = smov 0  }
   0x3   :  { %s711_s19 = smov 0   ;;  %s713_s20 = smov 0  }
   0x4 LB: > { %s508_s21 = sadd.s32 4294967295, %s674_s20   ;;  %s509_s22 = sadd.s32 4294967294, %s674_s20   ;;  %s674_s20 = sphi %s713_s20, %s17_s20   ;;  %s670_s19 = sphi %s711_s19, %s835_s19   ;;  %s666_s18 = sphi %s709_s18, %s834_s18   ;;  %s662_s17 = sphi %s707_s17, %s833_s17   ;;  %s658_s16 = sphi %s705_s16, %s832_s16   ;;  %s654_s15 = sphi %s703_s15, %s831_s15  }
   0x5   : > { %s36_s23 = sadd.s32 1, %s670_s19  ;;  %s143_s24 = sadd.s32 1, %s662_s17 }
   0x6   : > { %p38_p0 = scmp.ge.s32.totalorder %s36_s23, 2  ;;  %p153_p1 = scmp.ne.s32.totalorder %s662_s17, %s658_s16 }
   0x7   : > { %p154_p2 = scmp.eq.s32.totalorder %s508_s21, 1  ;;  %p159_p3 = scmp.ne.s32.totalorder %s658_s16, %s654_s15 }
   0x8   : > { %s837_s23 = smov (%p38_p0, %s36_s23), 0  ;;  %p160_p5 = scmp.eq.s32.totalorder %s509_s22, 1 }
   0x9   : > { %p743_p4 = por %p154_p2, %p153_p1  ;;  %s138_s26 = ssub.s32 %s670_s19, %s837_s23 }
   0xa   : > { %p513_p6 = scmp.ge.s32.totalorder %s674_s20, 1  ;;  %p141_p7 = scmp.eq.s32.totalorder %s138_s26, 0 }
   0xb   : > { %p750_p8 = por %p160_p5, %p159_p3  ;;  %p210_p9 = scmp.lt.s32.totalorder %s674_s20, 3 }
   0xc   : > { %s756_s28 = scalar_select %p141_p7, %s662_s17, %s143_s24  }
   0xd   : > { %p211_p10 = pnand %p513_p6, %p210_p9 }
   0xe   : > { %p255_p11 = scmp.lt.s32.totalorder (!%p211_p10), %s666_s18, 1  ;;  %v676_v0 = vmov (!%p211_p10), 0   ;;  %v371_v1 = vld [vmem:[%s825_s1] sm:$0xff] (!%p211_p10)  ;;  %vm314_vm0 = vcmask (!%p211_p10), 1041408   ;;  %vm310_vm1 = vcmask (!%p211_p10), 293888   ;;  %s246_s14 = sand.u32 (!%p211_p10), 1, %s658_s16  }
   0xf   : > { %214 = sbr.rel (%p211_p10) target bundleno = 273 (0x111), region = 36  ;;  %353 = vmatprep.mubr.bf16.mxu0 (!%p211_p10), %v676_v0  ;;  %587 = vset.pattern.permute.xlu0 (!%p211_p10), %v676_v0  ;;  %v379_v2 = vld [vmem:[%s826_s2] sm:$0xff] (!%p211_p10)  ;;  %s514_s21 = sshll.u32 (!%p211_p10), %s246_s14, 4 }
  0x10   : > { %374 = vperm.xlu0 (!%p211_p10), %587, %v371_v1   ;;  %v279_v11 = vld [vmem:[%s824_s0] sm:$0xf] (!%p211_p10)  ;;  %s529_s22 = sshll.u32 (!%p211_p10), %s666_s18, 8  ;;  %s248_s24 = scalar_lea.vmem (!%p211_p10), [#allocation3], %s514_s21 }
  0x11   : > { %s408_s26 = sshll.u32 (!%p211_p10), %s248_s24, 4  ;;  %s392_s6 = scalar_lea.sflag (!%p211_p10), [#allocation4], %s246_s14  ;;  %s779_s26 = int_to_ptr.vmem [resolvable:$true] %s408_s26 }
  0x12   : > { %s596_s7 = scalar_lea.vmem (!%p211_p10), %s779_s26, 256 }
  0x13   : > { %p597_p12 = scmp.ne.s32.totalorder (!%p211_p10), %s779_s26, %s596_s7 }
  0x14   : > { %382 = vperm.xlu0 (!%p211_p10), %587, %v379_v2  }
  0x15   : > { %p598_p13 = pnand (!%p211_p10), %p597_p12, %p743_p4 }
  0x16   : > { %s256_s5 = scalar_select %p255_p11, %s666_s18, 1 }
  0x17   : > { %p599_p0 = pneg %p598_p13  ;;  %s677_s18 = smov [#allocation3]  }
  0x18   : > { %s530_s8 = smul.u32 40, %s256_s5  ;;  %s777_s5 = scalar_lea.hbm %s828_s4, %s529_s22 }
  0x1a   : > { %s266_s11 = scalar_lea.vmem %s827_s3, %s530_s8  ;;  %s600_s8 = sshll.u32 %s677_s18, 4  ;;  %s601_s8 = int_to_ptr.vmem [resolvable:$false] %s600_s8 }
  0x1b   : > { %v588_v3 = vld [vmem:[%s266_s11 + $0x4] ss:$8 sps:$4 sm:$0xff]   ;;  %v590_v4 = vld [vmem:[%s266_s11] ss:$8 sps:$4 sm:$0xff]   ;;  %v591_v5 = vld [vmem:[%s266_s11 + $0x14] ss:$8 sps:$4 sm:$0xff]   ;;  %p603_p1 = scmp.lt.s32.totalorder %s779_s26, %s601_s8 }
  0x1c   : > { %321 = vmatprep.subr.bf16.mxu0 %v588_v3  ;;  %v284_v6 = vld [vmem:[%s266_s11 + $0x20] sm:$0x33]  ;;  %v593_v7 = vld [vmem:[%s266_s11 + $0x10] ss:$8 sps:$4 sm:$0xff]   ;;  %s602_s9 = scalar_lea.vmem %s601_s8, 512 }
  0x1d   : > { %322 = vmatpush1.bf16.msra.mxu0 %v590_v4  ;;  %v521_v8 = vcombine.high %v284_v6, %v284_v6  ;;  %v520_v9 = vcombine.low %v284_v6, %v284_v6  ;;  %p604_p2 = scmp.lt.s32.totalorder %s602_s9, %s596_s7 }
  0x1e   : > { %323 = vmatprep.subr.bf16.mxu0 %v591_v5 }
  0x1f   : > { %v316_v10 = vsel %vm314_vm0, %v520_v9, 0  ;;  %p605_p3 = por %p604_p2, %p603_p1 }
  0x21   : > { %324 = vmatpush1.bf16.msra.mxu0 %v593_v7  ;;  %p606_p5 = pnand %p605_p3, %p599_p0 }
  0x22   : > { %522 = vmatprep.subr.msk.bf16.mxu0 %vm314_vm0, %v521_v8 }
  0x25   : > { %326 = vmatpush1.bf16.msra.mxu0 %v316_v10 }
  0x28   : > { %523 = vmatmul.mubr.msk.bf16.vlgmr.msra.gmra.mrb[0].mxu0 %vm310_vm1, %v279_v11 }
  0x8f   : > { %v375_v12 = vpop.permute.xlu0 %374 }
  0x93   : > { %v383_v16 = vpop.permute.xlu0 %382 }
  0xfb   : > { %v355_v13 = vpop.f32.mrb[0].mxu0 }
  0xfc   : > { %v377_v14 = vmul.f32 %v375_v12, %v355_v13  ;;  %v357_v15 = vpop.f32.mrb[1].mxu0 }
  0xfd   : > { %v378_v17 = vmul.f32 %v375_v12, %v357_v15  ;;  %v359_v18 = vpop.f32.mrb[2].mxu0 }
  0xfe   : > { %v385_v19 = vadd.f32 %v383_v16, %v377_v14  ;;  %v360_v20 = vpop.f32.mrb[3].mxu0 }
  0xff   : > { %v386_v21 = vadd.f32 %v383_v16, %v378_v17 }
 0x100   : > { %v387_v22 = vmax.f32 %v385_v19, 0.0 }
 0x101   : > { %v388_v23 = vmax.f32 %v386_v21, 0.0 }
 0x102   : > { %389 = vst [vmem:[%s248_s24] sm:$0xff] %v387_v22 }
 0x103   : > { %390 = vst [vmem:[%s248_s24 + $0x8] sm:$0xff] %v388_v23 }
 0x104   : > { %609 = shalt.err (!%p606_p5)
}
 0x105   : > { %s610_s10 = scalar_lea.hbm %s777_s5, 256  ;;  %s614_s13 = scalar_lea.hbm %s828_s4, 512 }
 0x106   : > { %p611_p6 = scmp.ne.s32.totalorder %s777_s5, %s610_s10  ;;  %p615_p10 = scmp.lt.u32.totalorder %s777_s5, %s828_s4 }
 0x107   : > { %p616_p11 = scmp.lt.u32.totalorder %s614_s13, %s610_s10  ;;  %p618_p13 = scmp.lt.u32.totalorder %s610_s10, %s777_s5 }
 0x108   : > { %p612_p7 = pnand %p611_p6, %p743_p4 }
 0x109   : > { %p617_p12 = por %p616_p11, %p615_p10 }
 0x10a   : > { %p613_p9 = pneg %p612_p7 }
 0x10b   : > { %p619_p0 = por %p618_p13, %p617_p12 }
 0x10d   : > { %p620_p1 = pnand %p619_p0, %p613_p9 }
 0x10f   : > { %623 = shalt.err (!%p620_p1)
}
 0x110   : > { %531 = dma.vmem_to_hbm [thread:$0]  (%p743_p4), %s779_s26, 256, %s777_s5, %s392_s6  }
 0x111 PF: > { %p537_p2 = scmp.ge.s32.totalorder %s674_s20, 2  ;;  %s420_s22 = sand.u32 1, %s654_s15  }
 0x112   : > { %s421_s24 = scalar_lea.sflag [#allocation4], %s420_s22 }
 0x113   : > { %p534_p3 = pnand %p537_p2, %p750_p8 }
 0x115   : > { %649 = dma.done.wait (!%p534_p3), %s421_s24, 256  }
 0x116   : > { %651 = vsyncadd (!%p534_p3), %s421_s24, 4294967040  ;;  %s17_s20 = sadd.s32 1, %s674_s20   ;;  %s831_s15 = smov %s658_s16 }
 0x117   : > { %p14_p5 = scmp.ge.s32.totalorder %s17_s20, 4   ;;  %s832_s16 = smov %s662_s17 }
 0x118   : > { %s833_s17 = smov %s756_s28  ;;  %s834_s18 = smov %s670_s19 }
 0x119   : > { %s835_s19 = smov %s837_s23  ;;  %16 = sbr.rel (!%p14_p5) target bundleno = 4 (0x4), region = 82 }
 0x120   :  { %426 = vsyncpa [#allocation4], 1 }
 0x121   :  { %428 = vsyncpa [#allocation4 + $0x1], 1 }

</bundles_post_ra>
